<compile_context>
chip_gen: v5e
topology: v5e:2x2
jax: 0.10.0
libtpu: 0.0.40
codegen_flags: <defaults>
</compile_context>

<pallas_src>
import jax
import jax.numpy as jnp
from jax.experimental import pallas as pl
from jax.experimental.pallas import tpu as pltpu

LANE = 128


def _shape_function_kernel(r2):
    def kernel(c_ref, o_ref):
        # c_ref: (3, br, LANE) f32 ; o_ref: (br, LANE) f32
        x = c_ref[0]
        y = c_ref[1]
        z = c_ref[2]
        d2 = x * x + y * y + z * z                  # explicit 3-term unroll (VPU adds)
        # no sqrt: for d >= 0, (d <= r) <=> (d^2 <= r^2); exp goes to the EUP.
        o_ref[...] = jnp.where(d2 <= r2, jnp.exp(-d2), 0.0).astype(o_ref.dtype)
    return kernel


def _pick_block_rows(R, target):
    """Largest multiple of 8 that divides R and is <= target (else R itself).

    Caps the block at R//2 when possible so the grid has >= 2 parallel steps
    (keeps both v7x TensorCores busy)."""
    if R % 8 != 0 or R <= 8:
        return R
    if R >= 16:
        target = min(target, R // 2)
    best = 8
    br = 8
    while br <= min(target, R):
        if R % br == 0:
            best = br
        br += 8
    return best


def shape_function(coords, radius=0.03, target_block_rows=512):
    """coords: (B, N, 3) float -> (B, N) float32."""
    coords = coords.astype(jnp.float32)
    B, N, C = coords.shape
    assert C == 3
    P = B * N
    Pp = ((P + LANE - 1) // LANE) * LANE            # pad point count to a lane multiple

    flat = coords.reshape(P, 3)
    if Pp != P:
        flat = jnp.pad(flat, ((0, Pp - P), (0, 0)))
    R = Pp // LANE

    # Single relayout pass: point index -> lane axis.  allow_input_fusion below
    # lets XLA fuse this transpose into the pallas input DMA instead of
    # materializing an extra HBM pass.
    # TODO(synk): if the upstream producer can emit (3, P) directly, drop this relayout.
    coords_t = flat.T.reshape(3, R, LANE)

    br = _pick_block_rows(R, target_block_rows)     # ~64K points / ~1 MiB per step at 512
    grid = (R // br,)

    out = pl.pallas_call(
        _shape_function_kernel(radius * radius),
        out_shape=jax.ShapeDtypeStruct((R, LANE), jnp.float32),
        grid_spec=pltpu.PrefetchScalarGridSpec(
            num_scalar_prefetch=0,
            grid=grid,
            in_specs=[pl.BlockSpec((3, br, LANE), lambda i: (0, i, 0))],
            out_specs=pl.BlockSpec((br, LANE), lambda i: (i, 0)),
        ),
        compiler_params=pltpu.CompilerParams(
            dimension_semantics=("parallel",),
            allow_input_fusion=[True],
        ),
        cost_estimate=pl.CostEstimate(
            flops=7 * Pp, transcendentals=Pp, bytes_accessed=16 * Pp),
    )(coords_t)

    return out.reshape(Pp)[:P].reshape(B, N)


if __name__ == "__main__":
    def reference(c, radius=0.03):
        d = jnp.linalg.norm(c, axis=-1)
        return jnp.exp(-d ** 2) * (d <= radius).astype(jnp.float32)

    key = jax.random.PRNGKey(0)

    # Small shape consistent with the module: (batch=2, n_points=256, 3).
    B, N = 2, 256
    coords = 0.03 * jax.random.normal(key, (B, N, 3), dtype=jnp.float32)
    out = jax.block_until_ready(shape_function(coords, radius=0.03))
    assert out.shape == (B, N)
    assert jnp.allclose(out, reference(coords), atol=1e-6), "mismatch (small)"

    # Slightly larger shape to exercise the multi-step (grid > 1) tiled path.
    B2, N2 = 4, 2048
    coords2 = 0.03 * jax.random.normal(jax.random.PRNGKey(1), (B2, N2, 3),
                                       dtype=jnp.float32)
    out2 = jax.block_until_ready(shape_function(coords2, radius=0.03))
    assert out2.shape == (B2, N2)
    assert jnp.allclose(out2, reference(coords2), atol=1e-6), "mismatch (tiled)"

    print("KERNEL_OK")
</pallas_src>

<mosaic_0001>
module attributes {stable_mosaic.version = 11 : i64} {
  func.func @kernel(%arg0: i32, %arg1: memref<3x4x128xf32, #tpu.memory_space<vmem>>, %arg2: memref<4x128xf32, #tpu.memory_space<vmem>>) attributes {dimension_semantics = [#tpu.dimension_semantics<parallel>], iteration_bounds = array<i64: 1>, scalar_prefetch = 0 : i64, scratch_operands = 0 : i64, tpu.core_type = #tpu.core_type<tc>, window_params = [{transform_indices = @transform_0, window_bounds = array<i64: 3, 4, 128>}, {transform_indices = @transform_1, window_bounds = array<i64: 4, 128>}]} {
    %c0 = arith.constant 0 : index
    %c0_0 = arith.constant 0 : index
    %c0_1 = arith.constant 0 : index
    %0 = vector.load %arg1[%c0, %c0_0, %c0_1] : memref<3x4x128xf32, #tpu.memory_space<vmem>>, vector<1x4x128xf32>
    %1 = vector.shape_cast %0 : vector<1x4x128xf32> to vector<4x128xf32>
    %c1 = arith.constant 1 : index
    %c0_2 = arith.constant 0 : index
    %c0_3 = arith.constant 0 : index
    %2 = vector.load %arg1[%c1, %c0_2, %c0_3] : memref<3x4x128xf32, #tpu.memory_space<vmem>>, vector<1x4x128xf32>
    %3 = vector.shape_cast %2 : vector<1x4x128xf32> to vector<4x128xf32>
    %c2 = arith.constant 2 : index
    %c0_4 = arith.constant 0 : index
    %c0_5 = arith.constant 0 : index
    %4 = vector.load %arg1[%c2, %c0_4, %c0_5] : memref<3x4x128xf32, #tpu.memory_space<vmem>>, vector<1x4x128xf32>
    %5 = vector.shape_cast %4 : vector<1x4x128xf32> to vector<4x128xf32>
    %6 = arith.mulf %1, %1 : vector<4x128xf32>
    %7 = arith.mulf %3, %3 : vector<4x128xf32>
    %8 = arith.addf %6, %7 : vector<4x128xf32>
    %9 = arith.mulf %5, %5 : vector<4x128xf32>
    %10 = arith.addf %8, %9 : vector<4x128xf32>
    %cst = arith.constant 8.99999984E-4 : f32
    %11 = vector.broadcast %cst : f32 to vector<4x128xf32>
    %12 = arith.cmpf ole, %10, %11 : vector<4x128xf32>
    %cst_6 = arith.constant 0.000000e+00 : f32
    %13 = vector.broadcast %cst_6 : f32 to vector<4x128xf32>
    %14 = arith.subf %13, %10 : vector<4x128xf32>
    %15 = math.exp %14 : vector<4x128xf32>
    %cst_7 = arith.constant 0.000000e+00 : f32
    %16 = vector.broadcast %cst_7 : f32 to vector<4x128xf32>
    %17 = arith.select %12, %15, %16 : vector<4x128xi1>, vector<4x128xf32>
    %c0_8 = arith.constant 0 : index
    %c0_9 = arith.constant 0 : index
    %18 = vector.load %arg2[%c0_8, %c0_9] : memref<4x128xf32, #tpu.memory_space<vmem>>, vector<4x128xf32>
    tpu.vector_store %arg2[%c0_8, %c0_9], %17 {strides = array<i32>} : memref<4x128xf32, #tpu.memory_space<vmem>>, vector<4x128xf32>,
    return
  }
  func.func @transform_0(%arg0: i32) -> (i32, i32, i32) {
    %c0_i32 = arith.constant 0 : i32
    %c0_i32_0 = arith.constant 0 : i32
    %c0_i32_1 = arith.constant 0 : i32
    return %c0_i32, %arg0, %c0_i32_0 : i32, i32, i32
  }
  func.func @transform_1(%arg0: i32) -> (i32, i32) {
    %c0_i32 = arith.constant 0 : i32
    %c0_i32_0 = arith.constant 0 : i32
    return %arg0, %c0_i32 : i32, i32
  }
}

</mosaic_0001>

<bundles_post_ra>
// kernel: tpu_custom_call.1
= control target key start
LH: loop header
LB: loop body
LE: loop exit
PB: predicated region body
PF: predicated region fallthrough
CT: control target
= control target key end

     0   :  { %6 = vsyncpa [#allocation3], 0  ;;  %s136_s0 = inlined_call_operand.hbm [shape: f32[3,4,128], index: 0, kind: input, shape index: {}]   ;;  %s137_s1 = inlined_call_operand.hbm [shape: f32[4,128], index: 1, kind: output, shape index: {}]  }
   0x1   :  { %7 = vsyncpa [#allocation4], 0  ;;  %s12_s8 = sshll.u32 %s136_s0, 4  ;;  %s116_s9 = smov [#allocation2]   ;;  %s13_s8 = int_to_ptr.hbm [resolvable:$true] %s12_s8 }
   0x2   :  { %s14_s10 = sshll.u32 %s116_s9, 4  ;;  %s117_s11 = smov 64   ;;  %s15_s10 = int_to_ptr.vmem [resolvable:$true] %s14_s10 }
   0x3   :  { %s118_s12 = smov 4  }
   0x4   :  { %20 = dma.hbm_to_vmem [thread:$0]  %s13_s8, 192, %s15_s10, [#allocation3], %s117_s11, %s117_s11, %s118_s12  }
   0x5   :  { %112 = dma.done.wait [#allocation3], 192  }
   0x6   :  { %113 = vsyncadd [#allocation3], 4294967104  ;;  %v25_v0 = vld [vmem:[#allocation2] sm:$0xf]  ;;  %v27_v1 = vld [vmem:[#allocation2 + $0x4] sm:$0xf] }
   0x7   :  { %v29_v2 = vld [vmem:[#allocation2 + $0x8] sm:$0xf]  ;;  %v30_v3 = vmul.f32 %v25_v0, %v25_v0  ;;  %v31_v4 = vmul.f32 %v27_v1, %v27_v1  ;;  %s119_s0 = smov [#allocation5]   ;;  %s48_s16 = sshll.u32 %s137_s1, 4  ;;  %s49_s16 = int_to_ptr.hbm [resolvable:$true] %s48_s16 }
   0x8   :  { %v33_v5 = vmul.f32 %v29_v2, %v29_v2  ;;  %s46_s13 = sshll.u32 %s119_s0, 4  ;;  %s47_s13 = int_to_ptr.vmem [resolvable:$true] %s46_s13 }
   0x9   :  { %v32_v6 = vadd.f32 %v31_v4, %v30_v3 }
   0xb   :  { %v34_v7 = vadd.f32 %v33_v5, %v32_v6 }
   0xd   :  { %v36_v8 = vsub.f32 0.0, %v34_v7  ;;  %vm35_vm0 = vcmp.le.f32.partialorder %v34_v7, 0.0009 }
   0xf   :  { %v37_v9 = vmul.f32 1.442695, %v36_v8 }
  0x11   :  { %62 = vpow2.f32 %v37_v9 }
  0x17   :  { %v63_v10 = vpop.eup %62 }
  0x18   :  { %v39_v11 = vsel %vm35_vm0, %v63_v10, 0.0 }
  0x19   :  { %40 = vst [vmem:[#allocation5] sm:$0xf] %v39_v11 }
  0x1a   :  { %51 = dma.vmem_to_hbm [thread:$0]  %s47_s13, 64, %s49_s16, [#allocation4]  }
  0x1b   :  { %114 = dma.done.wait [#allocation4], 64  }
  0x1c   :  { %115 = vsyncadd [#allocation4], 4294967232 }
  0x1d   :  { %56 = vsyncpa [#allocation3], 1 }
  0x1e   :  { %57 = vsyncpa [#allocation4], 1 }

</bundles_post_ra>
